<compile_context>
chip_gen: v7x
topology: tpu7x:2x2x1
jax: 0.10.0
libtpu: 0.0.40
codegen_flags: <defaults>
</compile_context>

<pallas_src>
import functools
import math

import jax
import jax.numpy as jnp
from jax.experimental import pallas as pl
from jax.experimental.pallas import tpu as pltpu


# ----------------------------------------------------------------------------
# Helpers
# ----------------------------------------------------------------------------
def round_up(x, m):
    return ((x + m - 1) // m) * m


def pad_axis(a, target, axis):
    if a.shape[axis] == target:
        return a
    widths = [(0, 0)] * a.ndim
    widths[axis] = (0, target - a.shape[axis])
    return jnp.pad(a, widths)


# ----------------------------------------------------------------------------
# Pallas kernels
# ----------------------------------------------------------------------------
def encoder_layer_kernel(x_ref, bias_ref,
                         wqkv_ref, bqkv_ref,
                         wo_ref, bo_ref,
                         g1_ref, be1_ref,
                         w1_ref, b1_ref, w2_ref, b2_ref,
                         g2_ref, be2_ref,
                         o_ref, acc_ref, *, n_heads, e_real):
    """One transformer encoder block.

    Grid = (batch_tiles, n_heads).  Each step computes one head's attention
    contribution (fused Q/K/V per-head weight tile arrives via BlockSpec) and
    accumulates the output projection into a VMEM scratch; the last head step
    runs the residual + LayerNorm + FFN epilogue and writes the lane-dense
    output.
    """
    h_idx = pl.program_id(1)
    bt, s_len, e_pad = x_ref.shape
    dh_pad = wqkv_ref.shape[2] // 3
    rows = bt * s_len

    x2 = x_ref[...].reshape(rows, e_pad)        # f32 residual
    xb = x2.astype(jnp.bfloat16)

    # ---- fused Q/K/V projection for this head (scale folded into Wq/bq) ----
    qkv = jnp.dot(xb, wqkv_ref[0], preferred_element_type=jnp.float32) + bqkv_ref[0, 0]
    q = qkv[:, :dh_pad].reshape(bt, s_len, dh_pad)
    k = qkv[:, dh_pad:2 * dh_pad].reshape(bt, s_len, dh_pad)
    v = qkv[:, 2 * dh_pad:].reshape(bt, s_len, dh_pad)

    s = jnp.einsum('bqd,bkd->bqk', q.astype(jnp.bfloat16), k.astype(jnp.bfloat16),
                   preferred_element_type=jnp.float32)          # [bt, S, S]
    s = s + bias_ref[...]                                        # additive key mask

    # masked softmax in f32; reciprocal on the EUP
    s = s - jnp.max(s, axis=-1, keepdims=True)
    p = jnp.exp(s)
    p = p * pl.reciprocal(jnp.sum(p, axis=-1, keepdims=True), approx=True)

    ctx = jnp.einsum('bqk,bkd->bqd', p.astype(jnp.bfloat16), v.astype(jnp.bfloat16),
                     preferred_element_type=jnp.float32)         # [bt, S, dh_pad]
    ctx2 = ctx.reshape(rows, dh_pad).astype(jnp.bfloat16)

    head_out = jnp.dot(ctx2, wo_ref[0], preferred_element_type=jnp.float32)

    @pl.when(h_idx == 0)
    def _first():
        acc_ref[...] = head_out            # direct write: no zero-init + RMW

    @pl.when(h_idx != 0)
    def _rest():
        acc_ref[...] += head_out

    # ---- epilogue on the last head ------------------------------------------
    @pl.when(h_idx == n_heads - 1)
    def _epilogue():
        attn = acc_ref[...] + bo_ref[0]                 # [rows, E_pad]

        lane = jax.lax.broadcasted_iota(jnp.int32, (1, e_pad), 1)
        lane_mask = (lane < e_real).astype(jnp.float32)
        inv_e = 1.0 / float(e_real)

        def layer_norm(vv, g, b):
            # moments over the *real* embed width; padded lanes are zero.
            mu = jnp.sum(vv, axis=-1, keepdims=True) * inv_e
            d = (vv - mu) * lane_mask
            var = jnp.sum(d * d, axis=-1, keepdims=True) * inv_e
            return d * jax.lax.rsqrt(var + 1e-5) * g + b

        h1 = layer_norm(x2 + attn, g1_ref[0], be1_ref[0])

        ff = jnp.dot(h1.astype(jnp.bfloat16), w1_ref[...],
                     preferred_element_type=jnp.float32) + b1_ref[0]
        ff = jnp.maximum(ff, 0.0)
        ff = jnp.dot(ff.astype(jnp.bfloat16), w2_ref[...],
                     preferred_element_type=jnp.float32) + b2_ref[0]

        h2 = layer_norm(h1 + ff, g2_ref[0], be2_ref[0])
        o_ref[...] = h2.reshape(bt, s_len, e_pad).astype(o_ref.dtype)


def final_linear_kernel(x_ref, w_ref, b_ref, o_ref):
    """Lane-dense vocab projection on row-folded activations."""
    o_ref[...] = (jnp.dot(x_ref[...].astype(jnp.bfloat16), w_ref[...],
                          preferred_element_type=jnp.float32)
                  + b_ref[0]).astype(o_ref.dtype)


# ----------------------------------------------------------------------------
# Wrappers around pallas_call
# ----------------------------------------------------------------------------
def run_encoder_layer(x, attn_bias, L, n_heads, e_real, *, block_b=None):
    B, S, E_pad = x.shape
    H = n_heads
    dh_pad = L["wqkv"].shape[2] // 3
    F_pad = L["w1"].shape[1]
    bb = block_b or B
    assert B % bb == 0
    grid = (B // bb, H)

    rows_map = lambda b, h: (b, 0, 0)     # batch-tiled activations
    head_map = lambda b, h: (h, 0, 0)     # per-head weight tiles
    full_map = lambda b, h: (0, 0)        # layer-constant tensors

    in_specs = [
        pl.BlockSpec((bb, S, E_pad), rows_map),             # x
        pl.BlockSpec((bb, 1, S), rows_map),                 # additive key-mask bias
        pl.BlockSpec((1, E_pad, 3 * dh_pad), head_map),     # wqkv (fused)
        pl.BlockSpec((1, 1, 3 * dh_pad), head_map),         # bqkv (fused)
        pl.BlockSpec((1, dh_pad, E_pad), head_map),         # wo
        pl.BlockSpec((1, E_pad), full_map),                 # bo
        pl.BlockSpec((1, E_pad), full_map),                 # ln1 gamma
        pl.BlockSpec((1, E_pad), full_map),                 # ln1 beta
        pl.BlockSpec((E_pad, F_pad), full_map),             # w1
        pl.BlockSpec((1, F_pad), full_map),                 # b1
        pl.BlockSpec((F_pad, E_pad), full_map),             # w2
        pl.BlockSpec((1, E_pad), full_map),                 # b2
        pl.BlockSpec((1, E_pad), full_map),                 # ln2 gamma
        pl.BlockSpec((1, E_pad), full_map),                 # ln2 beta
    ]

    kernel = functools.partial(encoder_layer_kernel, n_heads=H, e_real=e_real)
    return pl.pallas_call(
        kernel,
        out_shape=jax.ShapeDtypeStruct((B, S, E_pad), jnp.float32),
        grid=grid,
        in_specs=in_specs,
        out_specs=pl.BlockSpec((bb, S, E_pad), rows_map),
        scratch_shapes=[pltpu.VMEM((bb * S, E_pad), jnp.float32)],
        compiler_params=pltpu.CompilerParams(
            dimension_semantics=("parallel", "arbitrary")),
    )(x, attn_bias,
      L["wqkv"], L["bqkv"], L["wo"], L["bo"],
      L["ln1_g"], L["ln1_b"],
      L["w1"], L["b1"], L["w2"], L["b2"],
      L["ln2_g"], L["ln2_b"])


def run_final_linear(x2d, w, b, *, block_rows=None, block_v=None):
    R, E_pad = x2d.shape
    V_pad = w.shape[1]
    br = block_rows or R
    bv = block_v or min(V_pad, 512)
    grid = (pl.cdiv(R, br), pl.cdiv(V_pad, bv))
    return pl.pallas_call(
        final_linear_kernel,
        out_shape=jax.ShapeDtypeStruct((R, V_pad), jnp.float32),
        grid=grid,
        in_specs=[
            pl.BlockSpec((br, E_pad), lambda i, j: (i, 0)),
            pl.BlockSpec((E_pad, bv), lambda i, j: (0, j)),
            pl.BlockSpec((1, bv), lambda i, j: (0, j)),
        ],
        out_specs=pl.BlockSpec((br, bv), lambda i, j: (i, j)),
        compiler_params=pltpu.CompilerParams(
            dimension_semantics=("parallel", "parallel")),
    )(x2d, w, b)


# ----------------------------------------------------------------------------
# Parameter init (f32, unpadded — mirrors the torch module) and kernel prep
# ----------------------------------------------------------------------------
def sinusoidal_positional_encoding(max_seq_length, embed_dim):
    pos = jnp.arange(max_seq_length, dtype=jnp.float32)[:, None]
    i = jnp.arange(0, embed_dim, 2, dtype=jnp.float32)[None, :]
    angle = pos / jnp.power(10000.0, i / embed_dim)
    pe = jnp.zeros((max_seq_length, embed_dim), dtype=jnp.float32)
    pe = pe.at[:, 0::2].set(jnp.sin(angle))
    pe = pe.at[:, 1::2].set(jnp.cos(angle))
    return pe


def init_params(key, src_vocab, tgt_vocab, embed_dim, d_ff, n_layers):
    keys = jax.random.split(key, 3 + n_layers)
    scale = 0.02
    params = {
        "embedding": scale * jax.random.normal(keys[0], (src_vocab, embed_dim), jnp.float32),
        "out_w": scale * jax.random.normal(keys[1], (embed_dim, tgt_vocab), jnp.float32),
        "out_b": jnp.zeros((1, tgt_vocab), jnp.float32),
        "layers": [],
    }
    for l in range(n_layers):
        lk = jax.random.split(keys[3 + l], 6)
        params["layers"].append({
            "wq": scale * jax.random.normal(lk[0], (embed_dim, embed_dim), jnp.float32),
            "bq": jnp.zeros((1, embed_dim), jnp.float32),
            "wk": scale * jax.random.normal(lk[1], (embed_dim, embed_dim), jnp.float32),
            "bk": jnp.zeros((1, embed_dim), jnp.float32),
            "wv": scale * jax.random.normal(lk[2], (embed_dim, embed_dim), jnp.float32),
            "bv": jnp.zeros((1, embed_dim), jnp.float32),
            "wo": scale * jax.random.normal(lk[3], (embed_dim, embed_dim), jnp.float32),
            "bo": jnp.zeros((1, embed_dim), jnp.float32),
            "ln1_g": jnp.ones((1, embed_dim), jnp.float32),
            "ln1_b": jnp.zeros((1, embed_dim), jnp.float32),
            "w1": scale * jax.random.normal(lk[4], (embed_dim, d_ff), jnp.float32),
            "b1": jnp.zeros((1, d_ff), jnp.float32),
            "w2": scale * jax.random.normal(lk[5], (d_ff, embed_dim), jnp.float32),
            "b2": jnp.zeros((1, embed_dim), jnp.float32),
            "ln2_g": jnp.ones((1, embed_dim), jnp.float32),
            "ln2_b": jnp.zeros((1, embed_dim), jnp.float32),
        })
    return params


def prepare_params(params, n_heads):
    """Pad / rearrange weights into the lane-dense, head-blocked kernel layout."""
    E = params["embedding"].shape[1]
    V = params["out_w"].shape[1]
    F = params["layers"][0]["w1"].shape[1]
    dh = E // n_heads
    E_pad = round_up(E, 128)
    assert E_pad % n_heads == 0, "n_heads must divide the padded embed dim"
    dh_pad = E_pad // n_heads
    assert dh_pad >= dh
    F_pad = round_up(F, 128)
    V_pad = round_up(V, 128)
    attn_scale = 1.0 / math.sqrt(dh)

    def split_heads_w(w):   # [E, E] -> [H, E_pad, dh_pad] (f32, per-head columns)
        w3 = w.reshape(E, n_heads, dh).transpose(1, 0, 2)          # [H, E, dh]
        return pad_axis(pad_axis(w3, E_pad, 1), dh_pad, 2)

    def split_heads_b(b):   # [1, E] -> [H, 1, dh_pad] (f32)
        b3 = b.reshape(1, n_heads, dh).transpose(1, 0, 2)          # [H, 1, dh]
        return pad_axis(b3, dh_pad, 2)

    prepped = {
        "embedding": pad_axis(params["embedding"], E_pad, 1),
        "out_w": pad_axis(pad_axis(params["out_w"], E_pad, 0), V_pad, 1).astype(jnp.bfloat16),
        "out_b": pad_axis(params["out_b"], V_pad, 1),
        "layers": [],
        "dims": dict(E=E, E_pad=E_pad, dh=dh, dh_pad=dh_pad,
                     F=F, F_pad=F_pad, V=V, V_pad=V_pad),
    }
    for L in params["layers"]:
        # Fused Q/K/V weight tile per head; attention scale folded into Q.
        wqkv = jnp.concatenate(
            [split_heads_w(L["wq"]) * attn_scale,
             split_heads_w(L["wk"]),
             split_heads_w(L["wv"])], axis=2).astype(jnp.bfloat16)   # [H, E_pad, 3*dh_pad]
        bqkv = jnp.concatenate(
            [split_heads_b(L["bq"]) * attn_scale,
             split_heads_b(L["bk"]),
             split_heads_b(L["bv"])], axis=2)                        # [H, 1, 3*dh_pad] f32
        wo = L["wo"].reshape(n_heads, dh, E)                         # [H, dh, E]
        wo = pad_axis(pad_axis(wo, dh_pad, 1), E_pad, 2).astype(jnp.bfloat16)
        prepped["layers"].append({
            "wqkv": wqkv, "bqkv": bqkv,
            "wo": wo, "bo": pad_axis(L["bo"], E_pad, 1),
            "ln1_g": pad_axis(L["ln1_g"], E_pad, 1),   # padded gamma = 0 keeps pad lanes zero
            "ln1_b": pad_axis(L["ln1_b"], E_pad, 1),
            "w1": pad_axis(pad_axis(L["w1"], E_pad, 0), F_pad, 1).astype(jnp.bfloat16),
            "b1": pad_axis(L["b1"], F_pad, 1),
            "w2": pad_axis(pad_axis(L["w2"], F_pad, 0), E_pad, 1).astype(jnp.bfloat16),
            "b2": pad_axis(L["b2"], E_pad, 1),
            "ln2_g": pad_axis(L["ln2_g"], E_pad, 1),
            "ln2_b": pad_axis(L["ln2_b"], E_pad, 1),
        })
    return prepped


# ----------------------------------------------------------------------------
# Full forward pass (glue in plain JAX, hot path in Pallas)
# ----------------------------------------------------------------------------
def transformer_forward(src, prepped, pe_pad, n_heads, apply_mask):
    """src: [B, S] int32 -> logits [B, S, tgt_vocab]"""
    B, S = src.shape
    dims = prepped["dims"]

    x = jnp.take(prepped["embedding"], src, axis=0) + pe_pad[None, :S, :]   # [B,S,E_pad]

    if apply_mask:
        key_mask = (src != 0)
    else:
        key_mask = jnp.ones_like(src, dtype=bool)
    # Additive key-mask bias computed once (hoisted out of the kernel).
    attn_bias = jnp.where(key_mask, 0.0, -1e9).astype(jnp.float32).reshape(B, 1, S)

    for L in prepped["layers"]:
        x = run_encoder_layer(x, attn_bias, L, n_heads, dims["E"])

    logits = run_final_linear(x.reshape(B * S, dims["E_pad"]),
                              prepped["out_w"], prepped["out_b"])
    return logits.reshape(B, S, dims["V_pad"])[:, :, :dims["V"]]


# ----------------------------------------------------------------------------
# Pure-JAX f32 reference (mirrors the torch module semantics)
# ----------------------------------------------------------------------------
def reference_forward(src, params, pe, n_heads, apply_mask):
    B, S = src.shape
    E = params["embedding"].shape[1]
    dh = E // n_heads
    x = params["embedding"][src] + pe[None, :S, :]
    if apply_mask:
        key_mask = (src != 0)
    else:
        key_mask = jnp.ones_like(src, dtype=bool)

    def ln(t, g, b):
        mu = t.mean(-1, keepdims=True)
        var = ((t - mu) ** 2).mean(-1, keepdims=True)
        return (t - mu) / jnp.sqrt(var + 1e-5) * g[0] + b[0]

    for L in params["layers"]:
        q = x @ L["wq"] + L["bq"][0]
        k = x @ L["wk"] + L["bk"][0]
        v = x @ L["wv"] + L["bv"][0]
        split = lambda t: t.reshape(B, S, n_heads, dh).transpose(0, 2, 1, 3)
        qh, kh, vh = split(q), split(k), split(v)
        s = jnp.einsum('bhqd,bhkd->bhqk', qh, kh) / math.sqrt(dh)
        s = jnp.where(key_mask[:, None, None, :], s, -1e9)
        p = jax.nn.softmax(s, axis=-1)
        ctx = jnp.einsum('bhqk,bhkd->bhqd', p, vh).transpose(0, 2, 1, 3).reshape(B, S, E)
        attn = ctx @ L["wo"] + L["bo"][0]
        x1 = ln(x + attn, L["ln1_g"], L["ln1_b"])
        ff = jnp.maximum(x1 @ L["w1"] + L["b1"][0], 0.0) @ L["w2"] + L["b2"][0]
        x = ln(x1 + ff, L["ln2_g"], L["ln2_b"])
    return x @ params["out_w"] + params["out_b"][0]


# ----------------------------------------------------------------------------
if __name__ == "__main__":
    src_vocab_size = 32
    tgt_vocab_size = 16
    embed_dim = 32
    max_seq_length = 8
    n_heads = 4
    n_layers = 2
    d_ff = 64
    apply_mask = True          # dropout_rate is an inference no-op

    batch = 2
    seq_len = max_seq_length

    key = jax.random.PRNGKey(0)
    pkey, dkey = jax.random.split(key)

    params = init_params(pkey, src_vocab_size, tgt_vocab_size,
                         embed_dim, d_ff, n_layers)
    pe = sinusoidal_positional_encoding(max_seq_length, embed_dim)

    prepped = prepare_params(params, n_heads)
    pe_pad = pad_axis(pe, prepped["dims"]["E_pad"], 1)

    # Deterministic tokens with a couple of padding (0) tokens so the mask path
    # is exercised.
    src = jax.random.randint(dkey, (batch, seq_len), 1, src_vocab_size,
                             dtype=jnp.int32)
    src = src.at[:, -2:].set(0)

    out = transformer_forward(src, prepped, pe_pad, n_heads, apply_mask)
    out = jax.block_until_ready(out)

    ref = jax.block_until_ready(
        reference_forward(src, params, pe, n_heads, apply_mask))

    assert out.shape == (batch, max_seq_length, tgt_vocab_size), out.shape
    assert bool(jnp.all(jnp.isfinite(out)))
    max_err = float(jnp.max(jnp.abs(out - ref)))
    assert max_err < 5e-2, f"mismatch vs f32 reference: {max_err}"
    print("KERNEL_OK")
</pallas_src>

<mosaic_0001>
module attributes {stable_mosaic.version = 11 : i64} {
  func.func @encoder_layer_kernel(%arg0: i32, %arg1: i32, %arg2: memref<2x8x128xf32, #tpu.memory_space<vmem>>, %arg3: memref<2x1x8xf32, #tpu.memory_space<vmem>>, %arg4: memref<1x128x96xbf16, #tpu.memory_space<vmem>>, %arg5: memref<1x1x96xf32, #tpu.memory_space<vmem>>, %arg6: memref<1x32x128xbf16, #tpu.memory_space<vmem>>, %arg7: memref<1x128xf32, #tpu.memory_space<vmem>>, %arg8: memref<1x128xf32, #tpu.memory_space<vmem>>, %arg9: memref<1x128xf32, #tpu.memory_space<vmem>>, %arg10: memref<128x128xbf16, #tpu.memory_space<vmem>>, %arg11: memref<1x128xf32, #tpu.memory_space<vmem>>, %arg12: memref<128x128xbf16, #tpu.memory_space<vmem>>, %arg13: memref<1x128xf32, #tpu.memory_space<vmem>>, %arg14: memref<1x128xf32, #tpu.memory_space<vmem>>, %arg15: memref<1x128xf32, #tpu.memory_space<vmem>>, %arg16: memref<2x8x128xf32, #tpu.memory_space<vmem>>, %arg17: memref<16x128xf32, #tpu.memory_space<vmem>>) attributes {dimension_semantics = [#tpu.dimension_semantics<parallel>, #tpu.dimension_semantics<arbitrary>], iteration_bounds = array<i64: 1, 4>, scalar_prefetch = 0 : i64, scratch_operands = 1 : i64, tpu.core_type = #tpu.core_type<tc>, window_params = [{transform_indices = @transform_0, window_bounds = array<i64: 2, 8, 128>}, {transform_indices = @transform_1, window_bounds = array<i64: 2, 1, 8>}, {transform_indices = @transform_2, window_bounds = array<i64: 1, 128, 96>}, {transform_indices = @transform_3, window_bounds = array<i64: 1, 1, 96>}, {transform_indices = @transform_4, window_bounds = array<i64: 1, 32, 128>}, {pipeline_mode = #tpu.pipeline_mode<synchronous>, transform_indices = @transform_5, window_bounds = array<i64: 1, 128>}, {pipeline_mode = #tpu.pipeline_mode<synchronous>, transform_indices = @transform_6, window_bounds = array<i64: 1, 128>}, {pipeline_mode = #tpu.pipeline_mode<synchronous>, transform_indices = @transform_7, window_bounds = array<i64: 1, 128>}, {pipeline_mode = #tpu.pipeline_mode<synchronous>, transform_indices = @transform_8, window_bounds = array<i64: 128, 128>}, {pipeline_mode = #tpu.pipeline_mode<synchronous>, transform_indices = @transform_9, window_bounds = array<i64: 1, 128>}, {pipeline_mode = #tpu.pipeline_mode<synchronous>, transform_indices = @transform_10, window_bounds = array<i64: 128, 128>}, {pipeline_mode = #tpu.pipeline_mode<synchronous>, transform_indices = @transform_11, window_bounds = array<i64: 1, 128>}, {pipeline_mode = #tpu.pipeline_mode<synchronous>, transform_indices = @transform_12, window_bounds = array<i64: 1, 128>}, {pipeline_mode = #tpu.pipeline_mode<synchronous>, transform_indices = @transform_13, window_bounds = array<i64: 1, 128>}, {transform_indices = @transform_14, window_bounds = array<i64: 2, 8, 128>}]} {
    %c0 = arith.constant 0 : index
    %c0_0 = arith.constant 0 : index
    %c0_1 = arith.constant 0 : index
    %0 = vector.load %arg2[%c0, %c0_0, %c0_1] : memref<2x8x128xf32, #tpu.memory_space<vmem>>, vector<2x8x128xf32>
    %1 = vector.shape_cast %0 : vector<2x8x128xf32> to vector<16x128xf32>
    %2 = arith.truncf %1 : vector<16x128xf32> to vector<16x128xbf16>
    %c0_2 = arith.constant 0 : index
    %c0_3 = arith.constant 0 : index
    %c0_4 = arith.constant 0 : index
    %3 = vector.load %arg4[%c0_2, %c0_3, %c0_4] : memref<1x128x96xbf16, #tpu.memory_space<vmem>>, vector<1x128x96xbf16>
    %4 = vector.shape_cast %3 : vector<1x128x96xbf16> to vector<128x96xbf16>
    %cst = arith.constant dense<0.000000e+00> : vector<16x96xf32>
    %5 = tpu.matmul %2, %4, %cst {dimension_numbers = #tpu.dot_dimension_numbers<[1], [0], [0], [1], [0, 0, 1, 1], [], []>} : vector<16x128xbf16>, vector<128x96xbf16>, vector<16x96xf32> -> vector<16x96xf32>
    %c0_5 = arith.constant 0 : index
    %c0_6 = arith.constant 0 : index
    %c0_7 = arith.constant 0 : index
    %6 = vector.load %arg5[%c0_5, %c0_6, %c0_7] : memref<1x1x96xf32, #tpu.memory_space<vmem>>, vector<1x1x96xf32>
    %7 = vector.shape_cast %6 : vector<1x1x96xf32> to vector<96xf32>
    %8 = vector.shape_cast %7 : vector<96xf32> to vector<1x96xf32>
    %9 = vector.broadcast %8 : vector<1x96xf32> to vector<16x96xf32>
    %10 = arith.addf %5, %9 : vector<16x96xf32>
    %11 = vector.extract_strided_slice %10 {offsets = [0, 0], sizes = [16, 32], strides = [1, 1]} : vector<16x96xf32> to vector<16x32xf32>
    %12 = vector.shape_cast %11 : vector<16x32xf32> to vector<2x8x32xf32>
    %13 = vector.extract_strided_slice %10 {offsets = [0, 32], sizes = [16, 32], strides = [1, 1]} : vector<16x96xf32> to vector<16x32xf32>
    %14 = vector.shape_cast %13 : vector<16x32xf32> to vector<2x8x32xf32>
    %15 = vector.extract_strided_slice %10 {offsets = [0, 64], sizes = [16, 32], strides = [1, 1]} : vector<16x96xf32> to vector<16x32xf32>
    %16 = vector.shape_cast %15 : vector<16x32xf32> to vector<2x8x32xf32>
    %17 = arith.truncf %12 : vector<2x8x32xf32> to vector<2x8x32xbf16>
    %18 = arith.truncf %14 : vector<2x8x32xf32> to vector<2x8x32xbf16>
    "tpu.trace_start"() <{level = 10 : i32, message = "bqd,bkd->bqk"}> : () -> ()
    %cst_8 = arith.constant dense<0.000000e+00> : vector<2x8x8xf32>
    %19 = tpu.matmul %17, %18, %cst_8 {dimension_numbers = #tpu.dot_dimension_numbers<[2], [2], [1], [1], [0, 0, 0, 1, 1, 1], [0], [0]>} : vector<2x8x32xbf16>, vector<2x8x32xbf16>, vector<2x8x8xf32> -> vector<2x8x8xf32>
    "tpu.trace_stop"() : () -> ()
    %c0_9 = arith.constant 0 : index
    %c0_10 = arith.constant 0 : index
    %c0_11 = arith.constant 0 : index
    %20 = vector.load %arg3[%c0_9, %c0_10, %c0_11] : memref<2x1x8xf32, #tpu.memory_space<vmem>>, vector<2x1x8xf32>
    %21 = vector.broadcast %20 : vector<2x1x8xf32> to vector<2x8x8xf32>
    %22 = arith.addf %19, %21 : vector<2x8x8xf32>
    %cst_12 = arith.constant dense<0xFF800000> : vector<2x8xf32>
    %23 = vector.multi_reduction <maximumf>, %22, %cst_12 [2] : vector<2x8x8xf32> to vector<2x8xf32>
    %24 = vector.shape_cast %23 : vector<2x8xf32> to vector<2x8x1xf32>
    %25 = vector.broadcast %24 : vector<2x8x1xf32> to vector<2x8x8xf32>
    %26 = arith.subf %22, %25 : vector<2x8x8xf32>
    %27 = math.exp %26 : vector<2x8x8xf32>
    %cst_13 = arith.constant dense<0.000000e+00> : vector<2x8xf32>
    %28 = vector.multi_reduction <add>, %27, %cst_13 [2] : vector<2x8x8xf32> to vector<2x8xf32>
    %29 = vector.shape_cast %28 : vector<2x8xf32> to vector<2x8x1xf32>
    %30 = tpu.reciprocal %29 {approx = true} : vector<2x8x1xf32> -> vector<2x8x1xf32>
    %31 = vector.broadcast %30 : vector<2x8x1xf32> to vector<2x8x8xf32>
    %32 = arith.mulf %27, %31 : vector<2x8x8xf32>
    %33 = arith.truncf %32 : vector<2x8x8xf32> to vector<2x8x8xbf16>
    %34 = arith.truncf %16 : vector<2x8x32xf32> to vector<2x8x32xbf16>
    "tpu.trace_start"() <{level = 10 : i32, message = "bqk,bkd->bqd"}> : () -> ()
    %cst_14 = arith.constant dense<0.000000e+00> : vector<2x8x32xf32>
    %35 = tpu.matmul %33, %34, %cst_14 {dimension_numbers = #tpu.dot_dimension_numbers<[2], [1], [1], [2], [0, 0, 0, 1, 1, 2], [0], [0]>} : vector<2x8x8xbf16>, vector<2x8x32xbf16>, vector<2x8x32xf32> -> vector<2x8x32xf32>
    "tpu.trace_stop"() : () -> ()
    %36 = vector.shape_cast %35 : vector<2x8x32xf32> to vector<16x32xf32>
    %37 = arith.truncf %36 : vector<16x32xf32> to vector<16x32xbf16>
    %c0_15 = arith.constant 0 : index
    %c0_16 = arith.constant 0 : index
    %c0_17 = arith.constant 0 : index
    %38 = vector.load %arg6[%c0_15, %c0_16, %c0_17] : memref<1x32x128xbf16, #tpu.memory_space<vmem>>, vector<1x32x128xbf16>
    %39 = vector.shape_cast %38 : vector<1x32x128xbf16> to vector<32x128xbf16>
    %cst_18 = arith.constant dense<0.000000e+00> : vector<16x128xf32>
    %40 = tpu.matmul %37, %39, %cst_18 {dimension_numbers = #tpu.dot_dimension_numbers<[1], [0], [0], [1], [0, 0, 1, 1], [], []>} : vector<16x32xbf16>, vector<32x128xbf16>, vector<16x128xf32> -> vector<16x128xf32>
    %c0_i32 = arith.constant 0 : i32
    %41 = arith.cmpi eq, %arg1, %c0_i32 : i32
    %42 = arith.extui %41 : i1 to i32
    %c0_i32_19 = arith.constant 0 : i32
    %43 = arith.cmpi ne, %42, %c0_i32_19 : i32
    scf.if %43 {
      %c0_23 = arith.constant 0 : index
      %c0_24 = arith.constant 0 : index
      %50 = vector.load %arg17[%c0_23, %c0_24] : memref<16x128xf32, #tpu.memory_space<vmem>>, vector<16x128xf32>
      tpu.vector_store %arg17[%c0_23, %c0_24], %40 {strides = array<i32>} : memref<16x128xf32, #tpu.memory_space<vmem>>, vector<16x128xf32>,
    } else {
    }
    %c0_i32_20 = arith.constant 0 : i32
    %44 = arith.cmpi ne, %arg1, %c0_i32_20 : i32
    %45 = arith.extui %44 : i1 to i32
    %c0_i32_21 = arith.constant 0 : i32
    %46 = arith.cmpi ne, %45, %c0_i32_21 : i32
    scf.if %46 {
      %c0_23 = arith.constant 0 : index
      %c0_24 = arith.constant 0 : index
      %50 = vector.load %arg17[%c0_23, %c0_24] : memref<16x128xf32, #tpu.memory_space<vmem>>, vector<16x128xf32>
      %51 = arith.addf %50, %40 : vector<16x128xf32>
      %c0_25 = arith.constant 0 : index
      %c0_26 = arith.constant 0 : index
      %52 = vector.load %arg17[%c0_25, %c0_26] : memref<16x128xf32, #tpu.memory_space<vmem>>, vector<16x128xf32>
      tpu.vector_store %arg17[%c0_25, %c0_26], %51 {strides = array<i32>} : memref<16x128xf32, #tpu.memory_space<vmem>>, vector<16x128xf32>,
    } else {
    }
    %c3_i32 = arith.constant 3 : i32
    %47 = arith.cmpi eq, %arg1, %c3_i32 : i32
    %48 = arith.extui %47 : i1 to i32
    %c0_i32_22 = arith.constant 0 : i32
    %49 = arith.cmpi ne, %48, %c0_i32_22 : i32
    scf.if %49 {
      %c0_23 = arith.constant 0 : index
      %c0_24 = arith.constant 0 : index
      %50 = vector.load %arg17[%c0_23, %c0_24] : memref<16x128xf32, #tpu.memory_space<vmem>>, vector<16x128xf32>
      %c0_25 = arith.constant 0 : index
      %c0_26 = arith.constant 0 : index
      %51 = vector.load %arg7[%c0_25, %c0_26] : memref<1x128xf32, #tpu.memory_space<vmem>>, vector<1x128xf32>
      %52 = vector.shape_cast %51 : vector<1x128xf32> to vector<128xf32>
      %53 = vector.shape_cast %52 : vector<128xf32> to vector<1x128xf32>
      %54 = vector.broadcast %53 : vector<1x128xf32> to vector<16x128xf32>
      %55 = arith.addf %50, %54 : vector<16x128xf32>
      %56 = tpu.iota {dimensions = array<i32: 1>} : vector<1x128xi32>
      %c32_i32 = arith.constant 32 : i32
      %57 = vector.broadcast %c32_i32 : i32 to vector<1x128xi32>
      %58 = arith.cmpi slt, %56, %57 : vector<1x128xi32>
      %59 = arith.extui %58 : vector<1x128xi1> to vector<1x128xi32>
      %60 = arith.sitofp %59 : vector<1x128xi32> to vector<1x128xf32>
      %61 = arith.addf %1, %55 : vector<16x128xf32>
      %c0_27 = arith.constant 0 : index
      %c0_28 = arith.constant 0 : index
      %62 = vector.load %arg8[%c0_27, %c0_28] : memref<1x128xf32, #tpu.memory_space<vmem>>, vector<1x128xf32>
      %63 = vector.shape_cast %62 : vector<1x128xf32> to vector<128xf32>
      %c0_29 = arith.constant 0 : index
      %c0_30 = arith.constant 0 : index
      %64 = vector.load %arg9[%c0_29, %c0_30] : memref<1x128xf32, #tpu.memory_space<vmem>>, vector<1x128xf32>
      %65 = vector.shape_cast %64 : vector<1x128xf32> to vector<128xf32>
      %cst_31 = arith.constant dense<0.000000e+00> : vector<16xf32>
      %66 = vector.multi_reduction <add>, %61, %cst_31 [1] : vector<16x128xf32> to vector<16xf32>
      %67 = vector.shape_cast %66 : vector<16xf32> to vector<16x1xf32>
      %cst_32 = arith.constant 3.125000e-02 : f32
      %68 = vector.broadcast %cst_32 : f32 to vector<16x1xf32>
      %69 = arith.mulf %67, %68 : vector<16x1xf32>
      %70 = vector.broadcast %69 : vector<16x1xf32> to vector<16x128xf32>
      %71 = arith.subf %61, %70 : vector<16x128xf32>
      %72 = vector.broadcast %60 : vector<1x128xf32> to vector<16x128xf32>
      %73 = arith.mulf %71, %72 : vector<16x128xf32>
      %74 = arith.mulf %73, %73 : vector<16x128xf32>
      %cst_33 = arith.constant dense<0.000000e+00> : vector<16xf32>
      %75 = vector.multi_reduction <add>, %74, %cst_33 [1] : vector<16x128xf32> to vector<16xf32>
      %76 = vector.shape_cast %75 : vector<16xf32> to vector<16x1xf32>
      %cst_34 = arith.constant 3.125000e-02 : f32
      %77 = vector.broadcast %cst_34 : f32 to vector<16x1xf32>
      %78 = arith.mulf %76, %77 : vector<16x1xf32>
      %cst_35 = arith.constant 9.99999974E-6 : f32
      %79 = vector.broadcast %cst_35 : f32 to vector<16x1xf32>
      %80 = arith.addf %78, %79 : vector<16x1xf32>
      %81 = math.rsqrt %80 : vector<16x1xf32>
      %82 = vector.broadcast %81 : vector<16x1xf32> to vector<16x128xf32>
      %83 = arith.mulf %73, %82 : vector<16x128xf32>
      %84 = vector.shape_cast %63 : vector<128xf32> to vector<1x128xf32>
      %85 = vector.broadcast %84 : vector<1x128xf32> to vector<16x128xf32>
      %86 = arith.mulf %83, %85 : vector<16x128xf32>
      %87 = vector.shape_cast %65 : vector<128xf32> to vector<1x128xf32>
      %88 = vector.broadcast %87 : vector<1x128xf32> to vector<16x128xf32>
      %89 = arith.addf %86, %88 : vector<16x128xf32>
      %90 = arith.truncf %89 : vector<16x128xf32> to vector<16x128xbf16>
      %c0_36 = arith.constant 0 : index
      %c0_37 = arith.constant 0 : index
      %91 = vector.load %arg10[%c0_36, %c0_37] : memref<128x128xbf16, #tpu.memory_space<vmem>>, vector<128x128xbf16>
      %cst_38 = arith.constant dense<0.000000e+00> : vector<16x128xf32>
      %92 = tpu.matmul %90, %91, %cst_38 {dimension_numbers = #tpu.dot_dimension_numbers<[1], [0], [0], [1], [0, 0, 1, 1], [], []>} : vector<16x128xbf16>, vector<128x128xbf16>, vector<16x128xf32> -> vector<16x128xf32>
      %c0_39 = arith.constant 0 : index
      %c0_40 = arith.constant 0 : index
      %93 = vector.load %arg11[%c0_39, %c0_40] : memref<1x128xf32, #tpu.memory_space<vmem>>, vector<1x128xf32>
      %94 = vector.shape_cast %93 : vector<1x128xf32> to vector<128xf32>
      %95 = vector.shape_cast %94 : vector<128xf32> to vector<1x128xf32>
      %96 = vector.broadcast %95 : vector<1x128xf32> to vector<16x128xf32>
      %97 = arith.addf %92, %96 : vector<16x128xf32>
      %cst_41 = arith.constant 0.000000e+00 : f32
      %98 = vector.broadcast %cst_41 : f32 to vector<16x128xf32>
      %99 = arith.maximumf %97, %98 : vector<16x128xf32>
      %100 = arith.truncf %99 : vector<16x128xf32> to vector<16x128xbf16>
      %c0_42 = arith.constant 0 : index
      %c0_43 = arith.constant 0 : index
      %101 = vector.load %arg12[%c0_42, %c0_43] : memref<128x128xbf16, #tpu.memory_space<vmem>>, vector<128x128xbf16>
      %cst_44 = arith.constant dense<0.000000e+00> : vector<16x128xf32>
      %102 = tpu.matmul %100, %101, %cst_44 {dimension_numbers = #tpu.dot_dimension_numbers<[1], [0], [0], [1], [0, 0, 1, 1], [], []>} : vector<16x128xbf16>, vector<128x128xbf16>, vector<16x128xf32> -> vector<16x128xf32>
      %c0_45 = arith.constant 0 : index
      %c0_46 = arith.constant 0 : index
      %103 = vector.load %arg13[%c0_45, %c0_46] : memref<1x128xf32, #tpu.memory_space<vmem>>, vector<1x128xf32>
      %104 = vector.shape_cast %103 : vector<1x128xf32> to vector<128xf32>
      %105 = vector.shape_cast %104 : vector<128xf32> to vector<1x128xf32>
      %106 = vector.broadcast %105 : vector<1x128xf32> to vector<16x128xf32>
      %107 = arith.addf %102, %106 : vector<16x128xf32>
      %108 = arith.addf %89, %107 : vector<16x128xf32>
      %c0_47 = arith.constant 0 : index
      %c0_48 = arith.constant 0 : index
      %109 = vector.load %arg14[%c0_47, %c0_48] : memref<1x128xf32, #tpu.memory_space<vmem>>, vector<1x128xf32>
      %110 = vector.shape_cast %109 : vector<1x128xf32> to vector<128xf32>
      %c0_49 = arith.constant 0 : index
      %c0_50 = arith.constant 0 : index
      %111 = vector.load %arg15[%c0_49, %c0_50] : memref<1x128xf32, #tpu.memory_space<vmem>>, vector<1x128xf32>
      %112 = vector.shape_cast %111 : vector<1x128xf32> to vector<128xf32>
      %cst_51 = arith.constant dense<0.000000e+00> : vector<16xf32>
      %113 = vector.multi_reduction <add>, %108, %cst_51 [1] : vector<16x128xf32> to vector<16xf32>
      %114 = vector.shape_cast %113 : vector<16xf32> to vector<16x1xf32>
      %cst_52 = arith.constant 3.125000e-02 : f32
      %115 = vector.broadcast %cst_52 : f32 to vector<16x1xf32>
      %116 = arith.mulf %114, %115 : vector<16x1xf32>
      %117 = vector.broadcast %116 : vector<16x1xf32> to vector<16x128xf32>
      %118 = arith.subf %108, %117 : vector<16x128xf32>
      %119 = vector.broadcast %60 : vector<1x128xf32> to vector<16x128xf32>
      %120 = arith.mulf %118, %119 : vector<16x128xf32>
      %121 = arith.mulf %120, %120 : vector<16x128xf32>
      %cst_53 = arith.constant dense<0.000000e+00> : vector<16xf32>
      %122 = vector.multi_reduction <add>, %121, %cst_53 [1] : vector<16x128xf32> to vector<16xf32>
      %123 = vector.shape_cast %122 : vector<16xf32> to vector<16x1xf32>
      %cst_54 = arith.constant 3.125000e-02 : f32
      %124 = vector.broadcast %cst_54 : f32 to vector<16x1xf32>
      %125 = arith.mulf %123, %124 : vector<16x1xf32>
      %cst_55 = arith.constant 9.99999974E-6 : f32
      %126 = vector.broadcast %cst_55 : f32 to vector<16x1xf32>
      %127 = arith.addf %125, %126 : vector<16x1xf32>
      %128 = math.rsqrt %127 : vector<16x1xf32>
      %129 = vector.broadcast %128 : vector<16x1xf32> to vector<16x128xf32>
      %130 = arith.mulf %120, %129 : vector<16x128xf32>
      %131 = vector.shape_cast %110 : vector<128xf32> to vector<1x128xf32>
      %132 = vector.broadcast %131 : vector<1x128xf32> to vector<16x128xf32>
      %133 = arith.mulf %130, %132 : vector<16x128xf32>
      %134 = vector.shape_cast %112 : vector<128xf32> to vector<1x128xf32>
      %135 = vector.broadcast %134 : vector<1x128xf32> to vector<16x128xf32>
      %136 = arith.addf %133, %135 : vector<16x128xf32>
      %137 = vector.shape_cast %136 : vector<16x128xf32> to vector<2x8x128xf32>
      %c0_56 = arith.constant 0 : index
      %c0_57 = arith.constant 0 : index
      %c0_58 = arith.constant 0 : index
      %138 = vector.load %arg16[%c0_56, %c0_57, %c0_58] : memref<2x8x128xf32, #tpu.memory_space<vmem>>, vector<2x8x128xf32>
      tpu.vector_store %arg16[%c0_56, %c0_57, %c0_58], %137 {strides = array<i32>} : memref<2x8x128xf32, #tpu.memory_space<vmem>>, vector<2x8x128xf32>,
    } else {
    }
    return
  }
  func.func @transform_0(%arg0: i32, %arg1: i32) -> (i32, i32, i32) {
    %c0_i32 = arith.constant 0 : i32
    %c0_i32_0 = arith.constant 0 : i32
    %c0_i32_1 = arith.constant 0 : i32
    return %arg0, %c0_i32, %c0_i32_0 : i32, i32, i32
  }
  func.func @transform_1(%arg0: i32, %arg1: i32) -> (i32, i32, i32) {
    %c0_i32 = arith.constant 0 : i32
    %c0_i32_0 = arith.constant 0 : i32
    %c0_i32_1 = arith.constant 0 : i32
    return %arg0, %c0_i32, %c0_i32_0 : i32, i32, i32
  }
  func.func @transform_2(%arg0: i32, %arg1: i32) -> (i32, i32, i32) {
    %c0_i32 = arith.constant 0 : i32
    %c0_i32_0 = arith.constant 0 : i32
    %c0_i32_1 = arith.constant 0 : i32
    return %arg1, %c0_i32, %c0_i32_0 : i32, i32, i32
  }
  func.func @transform_3(%arg0: i32, %arg1: i32) -> (i32, i32, i32) {
    %c0_i32 = arith.constant 0 : i32
    %c0_i32_0 = arith.constant 0 : i32
    %c0_i32_1 = arith.constant 0 : i32
    return %arg1, %c0_i32, %c0_i32_0 : i32, i32, i32
  }
  func.func @transform_4(%arg0: i32, %arg1: i32) -> (i32, i32, i32) {
    %c0_i32 = arith.constant 0 : i32
    %c0_i32_0 = arith.constant 0 : i32
    %c0_i32_1 = arith.constant 0 : i32
    return %arg1, %c0_i32, %c0_i32_0 : i32, i32, i32
  }
  func.func @transform_5(%arg0: i32, %arg1: i32) -> (i32, i32) {
    %c0_i32 = arith.constant 0 : i32
    %c0_i32_0 = arith.constant 0 : i32
    %c0_i32_1 = arith.constant 0 : i32
    return %c0_i32, %c0_i32_0 : i32, i32
  }
  func.func @transform_6(%arg0: i32, %arg1: i32) -> (i32, i32) {
    %c0_i32 = arith.constant 0 : i32
    %c0_i32_0 = arith.constant 0 : i32
    %c0_i32_1 = arith.constant 0 : i32
    return %c0_i32, %c0_i32_0 : i32, i32
  }
  func.func @transform_7(%arg0: i32, %arg1: i32) -> (i32, i32) {
    %c0_i32 = arith.constant 0 : i32
    %c0_i32_0 = arith.constant 0 : i32
    %c0_i32_1 = arith.constant 0 : i32
    return %c0_i32, %c0_i32_0 : i32, i32
  }
  func.func @transform_8(%arg0: i32, %arg1: i32) -> (i32, i32) {
    %c0_i32 = arith.constant 0 : i32
    %c0_i32_0 = arith.constant 0 : i32
    %c0_i32_1 = arith.constant 0 : i32
    return %c0_i32, %c0_i32_0 : i32, i32
  }
  func.func @transform_9(%arg0: i32, %arg1: i32) -> (i32, i32) {
    %c0_i32 = arith.constant 0 : i32
    %c0_i32_0 = arith.constant 0 : i32
    %c0_i32_1 = arith.constant 0 : i32
    return %c0_i32, %c0_i32_0 : i32, i32
  }
  func.func @transform_10(%arg0: i32, %arg1: i32) -> (i32, i32) {
    %c0_i32 = arith.constant 0 : i32
    %c0_i32_0 = arith.constant 0 : i32
    %c0_i32_1 = arith.constant 0 : i32
    return %c0_i32, %c0_i32_0 : i32, i32
  }
  func.func @transform_11(%arg0: i32, %arg1: i32) -> (i32, i32) {
    %c0_i32 = arith.constant 0 : i32
    %c0_i32_0 = arith.constant 0 : i32
    %c0_i32_1 = arith.constant 0 : i32
    return %c0_i32, %c0_i32_0 : i32, i32
  }
  func.func @transform_12(%arg0: i32, %arg1: i32) -> (i32, i32) {
    %c0_i32 = arith.constant 0 : i32
    %c0_i32_0 = arith.constant 0 : i32
    %c0_i32_1 = arith.constant 0 : i32
    return %c0_i32, %c0_i32_0 : i32, i32
  }
  func.func @transform_13(%arg0: i32, %arg1: i32) -> (i32, i32) {
    %c0_i32 = arith.constant 0 : i32
    %c0_i32_0 = arith.constant 0 : i32
    %c0_i32_1 = arith.constant 0 : i32
    return %c0_i32, %c0_i32_0 : i32, i32
  }
  func.func @transform_14(%arg0: i32, %arg1: i32) -> (i32, i32, i32) {
    %c0_i32 = arith.constant 0 : i32
    %c0_i32_0 = arith.constant 0 : i32
    %c0_i32_1 = arith.constant 0 : i32
    return %arg0, %c0_i32, %c0_i32_0 : i32, i32, i32
  }
}

</mosaic_0001>

<bundles_post_ra>
// kernel: tpu_custom_call.1
= control target key start
LH: loop header
LB: loop body
LE: loop exit
PB: predicated region body
PF: predicated region fallthrough
CT: control target
= control target key end

     0   :  { %19 = vsyncpa [#allocation4], 0  ;;  %s1835_s29 = smov 0   ;;  %s1837_s30 = smov 0   ;;  %s2065_s0 = inlined_call_operand.vmem [shape: f32[2,8,128], index: 0, kind: input, shape index: {}]   ;;  %s2066_s1 = inlined_call_operand.vmem [shape: f32[2,1,8], index: 1, kind: input, shape index: {}]   ;;  %s2067_s2 = inlined_call_operand.vmem [shape: bf16[4,128,96], index: 2, kind: input, shape index: {}]   ;;  %s2068_s3 = inlined_call_operand.vmem [shape: f32[4,1,96], index: 3, kind: input, shape index: {}]   ;;  %s2069_s4 = inlined_call_operand.vmem [shape: bf16[4,32,128], index: 4, kind: input, shape index: {}]   ;;  %s2070_s5 = inlined_call_operand.vmem [shape: f32[1,128], index: 5, kind: input, shape index: {}]   ;;  %s2071_s6 = inlined_call_operand.vmem [shape: f32[1,128], index: 6, kind: input, shape index: {}]   ;;  %s2072_s7 = inlined_call_operand.vmem [shape: f32[1,128], index: 7, kind: input, shape index: {}]   ;;  %s2073_s8 = inlined_call_operand.vmem [shape: bf16[128,128], index: 8, kind: input, shape index: {}]   ;;  %s2074_s9 = inlined_call_operand.vmem [shape: f32[1,128], index: 9, kind: input, shape index: {}]   ;;  %s2075_s10 = inlined_call_operand.vmem [shape: bf16[128,128], index: 10, kind: input, shape index: {}]   ;;  %s2076_s11 = inlined_call_operand.vmem [shape: f32[1,128], index: 11, kind: input, shape index: {}]   ;;  %s2077_s12 = inlined_call_operand.vmem [shape: f32[1,128], index: 12, kind: input, shape index: {}]   ;;  %s2078_s13 = inlined_call_operand.vmem [shape: f32[1,128], index: 13, kind: input, shape index: {}]   ;;  %s2079_s14 = inlined_call_operand.hbm [shape: f32[2,8,128], index: 14, kind: output, shape index: {}]  }
   0x1   :  { %s1839_s15 = smov 0  }
   0x2 LB: > { %s1425_s16 = sadd.s32 4294967295, %s1749_s15   ;;  %s34_s17 = sadd.s32 1, %s1745_s30  ;;  %s1749_s15 = sphi %s1839_s15, %s25_s15   ;;  %s1745_s30 = sphi %s1837_s30, %s2082_s30   ;;  %s1741_s29 = sphi %s1835_s29, %s2081_s29  }
   0x3   : > { %p35_p0 = scmp.ge.s32.totalorder %s34_s17, 4  ;;  %p1430_p1 = scmp.ge.s32.totalorder %s1749_s15, 1 }
   0x4   : > { %p464_p2 = scmp.lt.s32.totalorder %s1749_s15, 5 }
   0x5   : > { %s2084_s17 = smov (%p35_p0, %s34_s17), 0 }
   0x6   : > { %p465_p3 = pnand %p1430_p1, %p464_p2 }
   0x7   : > { %p533_p4 = scmp.lt.s32.totalorder (!%p465_p3), %s1741_s29, 3  ;;  %v1751_v0 = vmov (!%p465_p3), 0.0   ;;  %vm1752_vm0 = vmmov (!%p465_p3), 0   ;;  %v1879_v9 = vld [vmem:[%s2065_s0] sm:$0xff] (!%p465_p3)  ;;  %v1884_v10 = vld [vmem:[%s2065_s0 + $0x8] sm:$0xff] (!%p465_p3)  ;;  %s1753_s20 = smov (!%p465_p3), 96  }
   0x8   : > { %468 = sbr.rel (%p465_p3) target bundleno = 2474 (0x9aa), region = 76  ;;  %1524 = vmatprep.subr.bf16.mxu0 (!%p465_p3), %v1751_v0  ;;  %1540 = vmatprep.mubr.msk.bf16.mxu0 (!%p465_p3), %vm1752_vm0, %v1751_v0  ;;  %v550_v11 = vpack.c.bf16 (!%p465_p3), %v1884_v10, %v1879_v9  ;;  %vm682_vm1 = vcmask (!%p465_p3), 261120   ;;  %v1444_v25 = vld [vmem:[%s2066_s1] ss:$0 sm:$0xff] (!%p465_p3)  ;;  %vm778_vm2 = vcmask (!%p465_p3), 64512   ;;  %s1754_s25 = smov (!%p465_p3), 64  }
   0x9   : > { %1544 = vmatprep.subr.bf16.mxu1 (!%p465_p3), %v1751_v0  ;;  %1546 = vmatprep.mubr.msk.bf16.mxu1 (!%p465_p3), %vm1752_vm0, %v1751_v0  ;;  %v1445_v32 = vld [vmem:[%s2066_s1 + $0x1] ss:$0 sm:$0xff] (!%p465_p3)  ;;  %vm808_vm3 = vcmask (!%p465_p3), 1043456   ;;  %p1453_p5 = scmp.ne.s32.totalorder (!%p465_p3), %s1741_s29, 0 }
   0xf   : > { %s1861_s18 = scalar_select %p533_p4, %s1741_s29, 3 }
  0x11   : > { %s1484_s19 = sshll.u32 %s1861_s18, 6  ;;  %s1485_s26 = sshll.u32 %s1861_s18, 4 }
  0x12   : > { %s537_s22 = scalar_lea.vmem %s2067_s2, %s1484_s19  ;;  %s540_s19 = scalar_lea.vmem %s2068_s3, %s1861_s18 }
  0x13   : > { %v1655_v1 = vld [vmem:[%s537_s22] sm:$0xff]   ;;  %v1656_v2 = vld [vmem:[%s537_s22 + $0x8] sm:$0xff]   ;;  %v1657_v3 = vld [vmem:[%s537_s22 + $0x10] sm:$0xff]  }
  0x14   : > { %1525 = vmatpush3.bf16.msra.mxu0 %v1655_v1  ;;  %v1658_v4 = vld [vmem:[%s537_s22 + $0x18] sm:$0xff]   ;;  %v1659_v5 = vld [vmem:[%s537_s22 + $0x20] sm:$0xff]   ;;  %v1660_v6 = vld [vmem:[%s537_s22 + $0x28] sm:$0xff]  }
  0x15   : > { %1526 = vmatprep.subr.bf16.mxu0 %v1751_v0  ;;  %v1661_v7 = vld [vmem:[%s537_s22 + $0x30] sm:$0xff]   ;;  %v1662_v8 = vld [vmem:[%s537_s22 + $0x38] sm:$0xff]   ;;  %v1435_v12 = vld [vmem:[%s540_s19] ss:$0 sm:$0xff]  ;;  %s545_s19 = scalar_lea.vmem %s2069_s4, %s1485_s26 }
  0x16   : > { %v1663_v61 = vld [vmem:[%s545_s19] sm:$0xff]   ;;  %v1664_v62 = vld [vmem:[%s545_s19 + $0x8] sm:$0xff]  }
  0x18   : > { %1527 = vmatpush3.bf16.msra.mxu0 %v1656_v2 }
  0x19   : > { %1528 = vmatprep.subr.bf16.mxu0 %v1751_v0 }
  0x1c   : > { %1529 = vmatpush3.bf16.msra.mxu0 %v1657_v3 }
  0x1d   : > { %1530 = vmatprep.subr.bf16.mxu0 %v1751_v0 }
  0x20   : > { %1531 = vmatpush3.bf16.msra.mxu0 %v1658_v4 }
  0x21   : > { %1532 = vmatprep.subr.bf16.mxu0 %v1751_v0 }
  0x24   : > { %1533 = vmatpush3.bf16.msra.mxu0 %v1659_v5 }
  0x25   : > { %1534 = vmatprep.subr.bf16.mxu0 %v1751_v0 }
  0x28   : > { %1535 = vmatpush3.bf16.msra.mxu0 %v1660_v6 }
  0x29   : > { %1536 = vmatprep.subr.bf16.mxu0 %v1751_v0 }
  0x2c   : > { %1537 = vmatpush3.bf16.msra.mxu0 %v1661_v7 }
  0x2d   : > { %1538 = vmatprep.subr.bf16.mxu0 %v1751_v0 }
  0x30   : > { %1539 = vmatpush3.bf16.msra.mxu0 %v1662_v8 }
  0x31   : > { %1568 = vmatprep.subr.bf16.mxu0 %v1751_v0 }
  0x33   : > { %1541 = vmatmul.mubr.bf16.vlgmr.msra.gmra.mrb[0].mxu0 %v550_v11 }
  0x34   : > { %1572 = vmatprep.mubr.msk.bf16.mxu0 %vm1752_vm0, %v1751_v0  ;;  %1569 = vmatpush3.bf16.msra.mxu0 %v1663_v61 }
  0x35   : > { %1570 = vmatprep.subr.bf16.mxu0 %v1751_v0 }
  0x38   : > { %1571 = vmatpush3.bf16.msra.mxu0 %v1664_v62 }
 0x106   : > { %v656_v13 = vpop.f32.mrb[0].mxu0 }
 0x107   : > { %v657_v14 = vadd.f32 %v1435_v12, %v656_v13  ;;  %v1542_v15 = vpop.f32.mrb[1].mxu0 }
 0x108   : > { %v659_v16 = vpop.f32.mrb[2].mxu0 }
 0x109   : > { %v663_v17 = vpack.c.bf16 %v657_v14, %v657_v14  ;;  %v660_v18 = vadd.f32 %v1435_v12, %v659_v16  ;;  %v1543_v19 = vpop.f32.mrb[3].mxu0 }
 0x10b   : > { %680 = vrot.lane.b32.xlu0 %v663_v17, %s1753_s20  ;;  %v664_v20 = vpack.c.bf16 %v660_v18, %v660_v18 }
 0x10f   : > { %730 = vrot.lane.b32.xlu0 %v664_v20, %s1753_s20 }
 0x17d   : > { %v681_v21 = vpop.permute.xlu0 %680 }
 0x17e   : > { %v687_v22 = vsel %vm682_vm1, %v681_v21, 0 }
 0x17f   : > { %1545 = vmatpush3.bf16.xpose.msra.mxu1 %v687_v22 }
 0x180   : > { %1550 = vmatprep.subr.bf16.mxu1 %v1751_v0 }
 0x181   : > { %v731_v23 = vpop.permute.xlu0 %730 }
 0x182   : > { %v736_v24 = vsel %vm682_vm1, %v731_v23, 0 }
 0x186   : > { %1547 = vmatmul.mubr.msk.bf16.vlgmr.msra.gmra.mrb[0].mxu1 %vm682_vm1, %v663_v17 }
 0x187   : > { %1551 = vmatpush3.bf16.xpose.msra.mxu1 %v736_v24  ;;  %1552 = vmatprep.mubr.msk.bf16.mxu1 %vm1752_vm0, %v1751_v0 }
 0x188   : > { %1556 = vmatprep.subr.bf16.mxu1 %v1751_v0 }
 0x18e   : > { %1553 = vmatmul.mubr.msk.bf16.vlgmr.msra.gmra.mrb[4].mxu1 %vm682_vm1, %v664_v20 }
 0x18f   : > { %1558 = vmatprep.mubr.msk.bf16.mxu1 %vm1752_vm0, %v1751_v0 }
 0x259   : > { %v723_v26 = vpop.f32.mrb[0].mxu1 }
 0x25a   : > { %v724_v27 = vadd.f32 %v1444_v25, %v723_v26  ;;  %v1548_v28 = vpop.f32.mrb[1].mxu1 }
 0x25b   : > { %v726_v29 = vpop.f32.mrb[2].mxu1 }
 0x25c   : > { %v1549_v30 = vpop.f32.mrb[3].mxu1  ;;  %v779_v31 = vsel %vm778_vm2, %v724_v27, -inf }
 0x25d   : > { %780 = vmax.xlane.f32.xlu1 %v779_v31 }
 0x261   : > { %v772_v33 = vpop.f32.mrb[4].mxu1 }
 0x262   : > { %v773_v34 = vadd.f32 %v1445_v32, %v772_v33  ;;  %v1554_v35 = vpop.f32.mrb[5].mxu1 }
 0x263   : > { %v775_v36 = vpop.f32.mrb[6].mxu1 }
 0x264   : > { %v1555_v37 = vpop.f32.mrb[7].mxu1  ;;  %v782_v38 = vsel %vm778_vm2, %v773_v34, -inf }
 0x265   : > { %783 = vmax.xlane.f32.xlu1 %v782_v38 }
 0x276   : > { %803 = vrot.lane.b32.xlu1 %v663_v17, %s1754_s25 }
 0x2ea   : > { %v781_v39 = vpop.xlane.xlu1 %780 }
 0x2eb   : > { %v785_v40 = vsub.f32 %v724_v27, %v781_v39 }
 0x2ed   : > { %v787_v41 = vmul.f32 1.442695, %v785_v40 }
 0x2ef   : > { %1665 = vpow2.f32 %v787_v41 }
 0x2f2   : > { %v784_v42 = vpop.xlane.xlu1 %783 }
 0x2f3   : > { %v786_v43 = vsub.f32 %v773_v34, %v784_v42 }
 0x2f5   : > { %v789_v44 = vmul.f32 1.442695, %v786_v43 }
 0x2f6   : > { %v804_v45 = vpop.permute.xlu1 %803 }
 0x2f7   : > { %1667 = vpow2.f32 %v789_v44  ;;  %v810_v46 = vsel %vm808_vm3, %v804_v45, 0 }
 0x2f8   : > { %1557 = vmatpush3.bf16.msra.mxu1 %v810_v46 }
 0x2f9   : > { %v1666_v47 = vpop.eup %1665  ;;  %1562 = vmatprep.subr.bf16.mxu1 %v1751_v0 }
 0x2fa   : > { %v791_v48 = vsel %vm778_vm2, %v1666_v47, 0.0 }
 0x2fb   : > { %792 = vadd.xlane.f32.xlu0 %v791_v48 }
 0x301   : > { %v1668_v49 = vpop.eup %1667 }
 0x302   : > { %v794_v50 = vsel %vm778_vm2, %v1668_v49, 0.0 }
 0x303   : > { %795 = vadd.xlane.f32.xlu1 %v794_v50 }
 0x314   : > { %852 = vrot.lane.b32.xlu1 %v664_v20, %s1754_s25 }
 0x388   : > { %v793_v51 = vpop.xlane.xlu0 %792 }
 0x389   : > { %1669 = vrcp.f32 %v793_v51 }
 0x390   : > { %v796_v52 = vpop.xlane.xlu1 %795 }
 0x391   : > { %1671 = vrcp.f32 %v796_v52 }
 0x393   : > { %v1670_v53 = vpop.eup %1669 }
 0x394   : > { %v799_v54 = vmul.f32 %v1670_v53, %v1666_v47  ;;  %v853_v55 = vpop.permute.xlu1 %852 }
 0x395   : > { %v858_v57 = vsel %vm808_vm3, %v853_v55, 0 }
 0x396   : > { %v801_v56 = vpack.c.bf16 %v799_v54, %v799_v54 }
 0x398   : > { %1559 = vmatmul.mubr.msk.bf16.vlgmr.msra.gmra.mrb[8].mxu1 %vm778_vm2, %v801_v56 }
 0x399   : > { %1563 = vmatpush3.bf16.msra.mxu1 %v858_v57  ;;  %1564 = vmatprep.mubr.msk.bf16.mxu1 %vm1752_vm0, %v1751_v0 }
 0x39b   : > { %v1672_v58 = vpop.eup %1671 }
 0x39c   : > { %v800_v59 = vmul.f32 %v1672_v58, %v1668_v49 }
 0x39e   : > { %v802_v60 = vpack.c.bf16 %v800_v59, %v800_v59 }
 0x3a0   : > { %1565 = vmatmul.mubr.msk.bf16.vlgmr.msra.gmra.mrb[12].mxu1 %vm778_vm2, %v802_v60 }
 0x46b   : > { %v846_v63 = vpop.f32.mrb[8].mxu1 }
 0x46c   : > { %v1560_v1 = vpop.f32.mrb[9].mxu1 }
 0x46d   : > { %v849_v2 = vpop.f32.mrb[10].mxu1 }
 0x46e   : > { %v1561_v3 = vpop.f32.mrb[11].mxu1 }
 0x473   : > { %v894_v4 = vpop.f32.mrb[12].mxu1 }
 0x474   : > { %v900_v5 = vpack.c.bf16 %v894_v4, %v846_v63  ;;  %v1566_v6 = vpop.f32.mrb[13].mxu1 }
 0x475   : > { %v897_v7 = vpop.f32.mrb[14].mxu1 }
 0x476   : > { %v1567_v8 = vpop.f32.mrb[15].mxu1  ;;  %1573 = vmatmul.mubr.msk.bf16.vlgmr.msra.gmra.mrb[4].mxu0 %vm682_vm1, %v900_v5 }
 0x546   : > { %964 = sbr.rel (%p1453_p5) target bundleno = 1357 (0x54d), region = 80 }
 0x549   : > { %v954_v11 = vpop.f32.mrb[4].mxu0 }
 0x54a   : > { %v1574_v12 = vpop.f32.mrb[5].mxu0  ;;  %965 = vst [vmem:[#allocation2] sm:$0xff] (!%p1453_p5), %v954_v11 }
 0x54b   : > { %v957_v13 = vpop.f32.mrb[6].mxu0 }
 0x54c   : > { %v1575_v14 = vpop.f32.mrb[7].mxu0  ;;  %966 = vst [vmem:[#allocation2 + $0x8] sm:$0xff] (!%p1453_p5), %v957_v13 }
 0x54d PF: > { %p1454_p6 = scmp.eq.s32.totalorder %s1741_s29, 0 }
 0x54f   : > { %970 = sbr.rel (%p1454_p6) target bundleno = 1367 (0x557), region = 84 }
 0x551   : > { %v971_v0 = vld [vmem:[#allocation2] sm:$0xff] (!%p1454_p6) }
 0x552   : > { %v973_v16 = vadd.f32 (!%p1454_p6), %v971_v0, %v954_v11 }
 0x553   : > { %v972_v15 = vld [vmem:[#allocation2 + $0x8] sm:$0xff] (!%p1454_p6) }
 0x554   : > { %v974_v17 = vadd.f32 (!%p1454_p6), %v972_v15, %v957_v13  ;;  %975 = vst [vmem:[#allocation2] sm:$0xff] (!%p1454_p6), %v973_v16 }
 0x556   : > { %976 = vst [vmem:[#allocation2 + $0x8] sm:$0xff] %v974_v17 }
 0x557 PF: > { %p1455_p7 = scmp.ne.s32.totalorder %s1741_s29, 3 }
 0x558   : > { %v1456_v19 = vld [vmem:[%s2070_s5] ss:$0 sm:$0xff] (!%p1455_p7)  ;;  %v1755_v25 = vmov (!%p1455_p7), 0.0   ;;  %v992_v27 = vlaneseq (!%p1455_p7)  ;;  %v1674_v38 = vld [vmem:[%s2073_s8 + $0x8] sm:$0xff] (!%p1455_p7)   ;;  %v1675_v39 = vld [vmem:[%s2073_s8 + $0x10] sm:$0xff] (!%p1455_p7)   ;;  %vm1756_vm5 = vmmov (!%p1455_p7), 0  }
 0x559   : > { %980 = sbr.rel (%p1455_p7) target bundleno = 2448 (0x990), region = 88  ;;  %1576 = vmatprep.subr.bf16.mxu0 (!%p1455_p7), %v1755_v25  ;;  %1596 = vmatprep.subr.bf16.mxu1 (!%p1455_p7), %v1755_v25  ;;  %v1673_v26 = vld [vmem:[%s2073_s8] sm:$0xff] (!%p1455_p7)   ;;  %v1676_v40 = vld [vmem:[%s2073_s8 + $0x18] sm:$0xff] (!%p1455_p7)   ;;  %v1678_v42 = vld [vmem:[%s2073_s8 + $0x28] sm:$0xff] (!%p1455_p7)  }
 0x55a   : > { %1577 = vmatpush3.bf16.msra.mxu0 (!%p1455_p7), %v1673_v26  ;;  %v993_v28 = vand.u32 (!%p1455_p7), 127, %v992_v27  ;;  %v1677_v41 = vld [vmem:[%s2073_s8 + $0x20] sm:$0xff] (!%p1455_p7)   ;;  %1592 = vmatprep.mubr.msk.bf16.mxu0 (!%p1455_p7), %vm1756_vm5, %v1755_v25  ;;  %v1679_v43 = vld [vmem:[%s2073_s8 + $0x30] sm:$0xff] (!%p1455_p7)   ;;  %v1680_v44 = vld [vmem:[%s2073_s8 + $0x38] sm:$0xff] (!%p1455_p7)  }
 0x55b   : > { %1578 = vmatprep.subr.bf16.mxu0 (!%p1455_p7), %v1755_v25  ;;  %1612 = vmatprep.mubr.msk.bf16.mxu1 (!%p1455_p7), %vm1756_vm5, %v1755_v25  ;;  %v1681_v45 = vld [vmem:[%s2075_s10] sm:$0xff] (!%p1455_p7)   ;;  %v1682_v46 = vld [vmem:[%s2075_s10 + $0x8] sm:$0xff] (!%p1455_p7)   ;;  %v1683_v47 = vld [vmem:[%s2075_s10 + $0x10] sm:$0xff] (!%p1455_p7)  }
 0x55c   : > { %v981_v18 = vld [vmem:[#allocation2] sm:$0xff] (!%p1455_p7)  ;;  %vm994_vm4 = vcmp.lt.s32.totalorder (!%p1455_p7), %v993_v28, 32  ;;  %1597 = vmatpush3.bf16.msra.mxu1 (!%p1455_p7), %v1681_v45  ;;  %v1684_v48 = vld [vmem:[%s2075_s10 + $0x18] sm:$0xff] (!%p1455_p7)   ;;  %v1686_v50 = vld [vmem:[%s2075_s10 + $0x28] sm:$0xff] (!%p1455_p7)  }
 0x55d   : > { %v982_v20 = vld [vmem:[#allocation2 + $0x8] sm:$0xff] (!%p1455_p7)  ;;  %v990_v21 = vadd.f32 (!%p1455_p7), %v1456_v19, %v981_v18  ;;  %1598 = vmatprep.subr.bf16.mxu1 (!%p1455_p7), %v1755_v25  ;;  %v1685_v49 = vld [vmem:[%s2075_s10 + $0x20] sm:$0xff] (!%p1455_p7)   ;;  %v1687_v5 = vld [vmem:[%s2075_s10 + $0x30] sm:$0xff] (!%p1455_p7)  }
 0x55e   : > { %v991_v22 = vadd.f32 (!%p1455_p7), %v1456_v19, %v982_v20  ;;  %1579 = vmatpush3.bf16.msra.mxu0 (!%p1455_p7), %v1674_v38  ;;  %v1458_v59 = vld [vmem:[%s2071_s6] ss:$0 sm:$0xff] (!%p1455_p7)  ;;  %v1688_v6 = vld [vmem:[%s2075_s10 + $0x38] sm:$0xff] (!%p1455_p7)  }
 0x55f   : > { %v997_v23 = vadd.f32 (!%p1455_p7), %v990_v21, %v1879_v9  ;;  %1580 = vmatprep.subr.bf16.mxu0 (!%p1455_p7), %v1755_v25  ;;  %v1459_v63 = vld [vmem:[%s2072_s7] ss:$0 sm:$0xff] (!%p1455_p7) }
 0x560   : > { %v998_v24 = vadd.f32 %v991_v22, %v1884_v10  ;;  %v1944_v10 = vsel %vm994_vm4, 1.0, %v1755_v25  ;;  %1599 = vmatpush3.bf16.msra.mxu1 %v1682_v46  ;;  %v1460_v7 = vld [vmem:[%s2074_s9] ss:$0 sm:$0xff] }
 0x561   : > { %1001 = vadd.xlane.f32.xlu0 %v997_v23  ;;  %1600 = vmatprep.subr.bf16.mxu1 %v1755_v25  ;;  %v1469_v18 = vld [vmem:[%s2076_s11] ss:$0 sm:$0xff] }
 0x562   : > { %1581 = vmatpush3.bf16.msra.mxu0 %v1675_v39 }
 0x563   : > { %1582 = vmatprep.subr.bf16.mxu0 %v1755_v25 }
 0x564   : > { %1601 = vmatpush3.bf16.msra.mxu1 %v1683_v47 }
 0x565   : > { %1003 = vadd.xlane.f32.xlu0 %v998_v24  ;;  %1602 = vmatprep.subr.bf16.mxu1 %v1755_v25 }
 0x566   : > { %1583 = vmatpush3.bf16.msra.mxu0 %v1676_v40 }
 0x567   : > { %1584 = vmatprep.subr.bf16.mxu0 %v1755_v25 }
 0x568   : > { %1603 = vmatpush3.bf16.msra.mxu1 %v1684_v48 }
 0x569   : > { %1604 = vmatprep.subr.bf16.mxu1 %v1755_v25 }
 0x56a   : > { %1585 = vmatpush3.bf16.msra.mxu0 %v1677_v41 }
 0x56b   : > { %1586 = vmatprep.subr.bf16.mxu0 %v1755_v25 }
 0x56c   : > { %1605 = vmatpush3.bf16.msra.mxu1 %v1685_v49 }
 0x56d   : > { %1606 = vmatprep.subr.bf16.mxu1 %v1755_v25 }
 0x56e   : > { %1587 = vmatpush3.bf16.msra.mxu0 %v1678_v42 }
 0x56f   : > { %1588 = vmatprep.subr.bf16.mxu0 %v1755_v25 }
 0x570   : > { %1607 = vmatpush3.bf16.msra.mxu1 %v1686_v50 }
 0x571   : > { %1608 = vmatprep.subr.bf16.mxu1 %v1755_v25 }
 0x572   : > { %1589 = vmatpush3.bf16.msra.mxu0 %v1679_v43  ;;  %v1478_v43 = vld [vmem:[%s2077_s12] ss:$0 sm:$0xff] }
 0x573   : > { %1590 = vmatprep.subr.bf16.mxu0 %v1755_v25 }
 0x574   : > { %1609 = vmatpush3.bf16.msra.mxu1 %v1687_v5 }
 0x575   : > { %1610 = vmatprep.subr.bf16.mxu1 %v1755_v25 }
 0x576   : > { %1591 = vmatpush3.bf16.msra.mxu0 %v1680_v44 }
 0x578   : > { %1611 = vmatpush3.bf16.msra.mxu1 %v1688_v6 }
 0x5ee   : > { %v1002_v9 = vpop.xlane.xlu0 %1001 }
 0x5ef   : > { %v1005_v29 = vmul.f32 0.03125, %v1002_v9 }
 0x5f1   : > { %v1007_v30 = vsub.f32 %v997_v23, %v1005_v29 }
 0x5f2   : > { %v1004_v31 = vpop.xlane.xlu0 %1003 }
 0x5f3   : > { %v1006_v32 = vmul.f32 0.03125, %v1004_v31  ;;  %v1009_v33 = vmul.f32 %v1944_v10, %v1007_v30 }
 0x5f5   : > { %v1008_v34 = vsub.f32 %v998_v24, %v1006_v32  ;;  %v1011_v35 = vmul.f32 %v1009_v33, %v1009_v33 }
 0x5f7   : > { %1013 = vadd.xlane.f32.xlu1 %v1011_v35  ;;  %v1010_v36 = vmul.f32 %v1944_v10, %v1008_v34 }
 0x5f9   : > { %v1012_v37 = vmul.f32 %v1010_v36, %v1010_v36 }
 0x5fb   : > { %1015 = vadd.xlane.f32.xlu1 %v1012_v37 }
 0x684   : > { %v1014_v51 = vpop.xlane.xlu1 %1013 }
 0x685   : > { %v1017_v52 = vmul.f32 0.03125, %v1014_v51 }
 0x687   : > { %v1019_v53 = vadd.f32 1e-05, %v1017_v52 }
 0x688   : > { %v1016_v54 = vpop.xlane.xlu1 %1015 }
 0x689   : > { %1689 = vrsqrt.f32 %v1019_v53  ;;  %v1018_v55 = vmul.f32 0.03125, %v1016_v54 }
 0x68b   : > { %v1020_v56 = vadd.f32 1e-05, %v1018_v55 }
 0x68d   : > { %1691 = vrsqrt.f32 %v1020_v56 }
 0x693   : > { %v1690_v57 = vpop.eup %1689 }
 0x694   : > { %v1023_v58 = vmul.f32 %v1690_v57, %v1009_v33 }
 0x696   : > { %v1031_v62 = vmul.f32 %v1458_v59, %v1023_v58 }
 0x697   : > { %v1692_v60 = vpop.eup %1691 }
 0x698   : > { %v1024_v61 = vmul.f32 %v1692_v60, %v1010_v36  ;;  %v1039_v2 = vadd.f32 %v1459_v63, %v1031_v62 }
 0x69a   : > { %v1032_v1 = vmul.f32 %v1458_v59, %v1024_v61 }
 0x69c   : > { %v1040_v3 = vadd.f32 %v1459_v63, %v1032_v1 }
 0x69e   : > { %v1041_v4 = vpack.c.bf16 %v1040_v3, %v1039_v2 }
 0x6a0   : > { %1593 = vmatmul.mubr.bf16.vlgmr.msra.gmra.mrb[0].mxu0 %v1041_v4 }
 0x773   : > { %v1147_v8 = vpop.f32.mrb[0].mxu0 }
 0x774   : > { %v1148_v11 = vadd.f32 %v1460_v7, %v1147_v8  ;;  %v1594_v12 = vpop.f32.mrb[1].mxu0 }
 0x775   : > { %v1150_v13 = vpop.f32.mrb[2].mxu0 }
 0x776   : > { %v1151_v14 = vadd.f32 %v1460_v7, %v1150_v13  ;;  %v1595_v0 = vpop.f32.mrb[3].mxu0  ;;  %v1154_v15 = vmax.f32 %v1148_v11, 0.0 }
 0x778   : > { %v1155_v16 = vmax.f32 %v1151_v14, 0.0 }
 0x77a   : > { %v1156_v17 = vpack.c.bf16 %v1155_v16, %v1154_v15 }
 0x77c   : > { %1613 = vmatmul.mubr.bf16.vlgmr.msra.gmra.mrb[0].mxu1 %v1156_v17 }
 0x84f   : > { %v1262_v19 = vpop.f32.mrb[0].mxu1 }
 0x850   : > { %v1263_v20 = vadd.f32 %v1469_v18, %v1262_v19  ;;  %v1614_v21 = vpop.f32.mrb[1].mxu1 }
 0x851   : > { %v1265_v22 = vpop.f32.mrb[2].mxu1 }
 0x852   : > { %v1266_v23 = vadd.f32 %v1469_v18, %v1265_v22  ;;  %v1615_v24 = vpop.f32.mrb[3].mxu1  ;;  %v1269_v25 = vadd.f32 %v1263_v20, %v1039_v2 }
 0x854   : > { %1273 = vadd.xlane.f32.xlu0 %v1269_v25  ;;  %v1270_v26 = vadd.f32 %v1266_v23, %v1040_v3 }
 0x856   : > { %1275 = vadd.xlane.f32.xlu1 %v1270_v26 }
 0x8e1   : > { %v1274_v27 = vpop.xlane.xlu0 %1273 }
 0x8e2   : > { %v1277_v28 = vmul.f32 0.03125, %v1274_v27 }
 0x8e3   : > { %v1276_v9 = vpop.xlane.xlu1 %1275 }
 0x8e4   : > { %v1279_v29 = vsub.f32 %v1269_v25, %v1277_v28  ;;  %v1278_v30 = vmul.f32 0.03125, %v1276_v9 }
 0x8e6   : > { %v1280_v31 = vsub.f32 %v1270_v26, %v1278_v30  ;;  %v1281_v32 = vmul.f32 %v1944_v10, %v1279_v29 }
 0x8e8   : > { %v1283_v33 = vmul.f32 %v1281_v32, %v1281_v32  ;;  %v1282_v34 = vmul.f32 %v1944_v10, %v1280_v31  ;;  %v1479_v10 = vld [vmem:[%s2078_s13] ss:$0 sm:$0xff] }
 0x8ea   : > { %1285 = vadd.xlane.f32.xlu0 %v1283_v33  ;;  %v1284_v35 = vmul.f32 %v1282_v34, %v1282_v34 }
 0x8ec   : > { %1287 = vadd.xlane.f32.xlu1 %v1284_v35 }
 0x977   : > { %v1286_v36 = vpop.xlane.xlu0 %1285 }
 0x978   : > { %v1289_v37 = vmul.f32 0.03125, %v1286_v36 }
 0x979   : > { %v1288_v38 = vpop.xlane.xlu1 %1287 }
 0x97a   : > { %v1291_v39 = vadd.f32 1e-05, %v1289_v37  ;;  %v1290_v40 = vmul.f32 0.03125, %v1288_v38 }
 0x97c   : > { %1693 = vrsqrt.f32 %v1291_v39  ;;  %v1292_v41 = vadd.f32 1e-05, %v1290_v40 }
 0x97e   : > { %1695 = vrsqrt.f32 %v1292_v41 }
 0x986   : > { %v1694_v42 = vpop.eup %1693 }
 0x987   : > { %v1295_v44 = vmul.f32 %v1694_v42, %v1281_v32 }
 0x988   : > { %v1696_v45 = vpop.eup %1695 }
 0x989   : > { %v1303_v46 = vmul.f32 %v1478_v43, %v1295_v44  ;;  %v1296_v47 = vmul.f32 %v1696_v45, %v1282_v34 }
 0x98b   : > { %v1311_v48 = vadd.f32 %v1479_v10, %v1303_v46  ;;  %v1304_v49 = vmul.f32 %v1478_v43, %v1296_v47 }
 0x98d   : > { %1313 = vst [vmem:[#allocation3] sm:$0xff] %v1311_v48  ;;  %v1312_v50 = vadd.f32 %v1479_v10, %v1304_v49 }
 0x98f   : > { %1314 = vst [vmem:[#allocation3 + $0x8] sm:$0xff] %v1312_v50 }
 0x990 PF: > { %p2030_p8 = scmp.eq.s32.totalorder %s1425_s16, 3  ;;  %s1757_s19 = smov [#allocation3]  }
 0x991   : > { %s1324_s18 = sshll.u32 %s1757_s19, 4  ;;  %s1325_s18 = int_to_ptr.vmem [resolvable:$true] %s1324_s18 }
 0x992   : > { %s1697_s20 = scalar_lea.vmem %s1325_s18, 256  ;;  %p1704_p12 = scmp.lt.s32.totalorder %s1325_s18, %s1325_s18 }
 0x993   : > { %p1698_p9 = scmp.ne.s32.totalorder %s1325_s18, %s1697_s20  ;;  %p1705_p13 = scmp.lt.s32.totalorder %s1697_s20, %s1697_s20 }
 0x995   : > { %p1699_p10 = pnand %p1698_p9, %p2030_p8  ;;  %p1706_p0 = por %p1705_p13, %p1704_p12 }
 0x997   : > { %p1700_p11 = pneg %p1699_p10 }
 0x999   : > { %p1707_p1 = pnand %p1706_p0, %p1700_p11 }
 0x99b   : > { %1710 = shalt.err (!%p1707_p1)
}
 0x99c   : > { %s1711_s16 = scalar_lea.hbm %s2079_s14, 256 }
 0x99d   : > { %p1712_p2 = scmp.ne.s32.totalorder %s2079_s14, %s1711_s16  ;;  %p1717_p5 = scmp.lt.u32.totalorder %s1711_s16, %s2079_s14 }
 0x99f   : > { %p1713_p3 = pnand %p1712_p2, %p2030_p8 }
 0x9a1   : > { %p1714_p4 = pneg %p1713_p3 }
 0x9a3   : > { %p1719_p6 = pnand %p1717_p5, %p1714_p4 }
 0x9a5   : > { %1722 = shalt.err (!%p1719_p6)
}
 0x9a6   : > { %s1758_s26 = smov 128   ;;  %s1759_s27 = smov 8  }
 0x9a7   : > { %1617 = dma.vmem_to_hbm [thread:$0]  (%p2030_p8), %s1325_s18, 256, %s2079_s14, [#allocation4], %s1758_s26, %s1758_s26, %s1759_s27  }
 0x9a8   : > { %1736 = dma.done.wait (%p2030_p8), [#allocation4], 256  }
 0x9a9   : > { %1738 = vsyncadd (%p2030_p8), [#allocation4], 4294967040 }
 0x9aa PF: > { %s25_s15 = sadd.s32 1, %s1749_s15   ;;  %s2081_s29 = smov %s1745_s30 }
 0x9ab   : > { %p22_p7 = scmp.ge.s32.totalorder %s25_s15, 6   ;;  %s2082_s30 = smov %s2084_s17 }
 0x9ad   :  { %24 = sbr.rel (!%p22_p7) target bundleno = 2 (0x2), region = 128 }
 0x9b4   :  { %1340 = vsyncpa [#allocation4], 1 }
 0x9b5   :  { %1342 = vsyncpa [#allocation4 + $0x1], 1 }

</bundles_post_ra>
